<compile_context>
chip_gen: v7x
topology: tpu7x:2x2x1
jax: 0.10.0
libtpu: 0.0.40
codegen_flags: <defaults>
</compile_context>

<pallas_src>
from functools import partial

import jax
import jax.numpy as jnp
import numpy as np
from jax.experimental import pallas as pl
from jax.experimental.pallas import tpu as pltpu

# Blocks (double-buffered) are sized against _VMEM_BLOCK_BUDGET; the scoped VMEM
# limit is raised to _VMEM_LIMIT, above the 16 MiB v5e / 32 MiB v6e defaults yet
# safely below the 64 MiB-per-TC v7x physical capacity.
_VMEM_LIMIT = 32 * 1024 * 1024
_VMEM_BLOCK_BUDGET = 12 * 1024 * 1024


# ---------------------------------------------------------------------------
# Kernel 1: conv3x3 as one MXU matmul over im2col patches + packed BN stats.
#   p_ref    : (1, TM, Kp)      bf16 im2col patches (Kp = 9*Cin padded to 8)
#   w_ref    : (Kp, Cout)       bf16 flattened HWIO weights
#   o_ref    : (1, TM, Cout)    bf16 conv output tile
#   stat_ref : (1, 1, 2, Cout)  f32 packed per-tile [channel sum ; channel sumsq]
# ---------------------------------------------------------------------------
def conv_stats_kernel(p_ref, w_ref, o_ref, stat_ref):
    acc = jnp.dot(p_ref[0], w_ref[...],
                  preferred_element_type=jnp.float32)          # (TM, Cout) f32
    o_ref[...] = acc.astype(o_ref.dtype).reshape(o_ref.shape)
    stat_ref[0, 0, 0:1, :] = jnp.sum(acc, axis=0, keepdims=True)
    stat_ref[0, 0, 1:2, :] = jnp.sum(acc * acc, axis=0, keepdims=True)


# ---------------------------------------------------------------------------
# Kernel 2: fused BN affine + ReLU on a lane-dense (rows, W*Cout) view.
#   x_ref     : (TR, W*Cout) bf16
#   scale_ref : (1,  W*Cout) f32   gamma / sqrt(var+eps), tiled over W
#   shift_ref : (1,  W*Cout) f32   beta - mean*scale,     tiled over W
#   o_ref     : (TR, W*Cout) f32
# ---------------------------------------------------------------------------
def bn_relu_kernel(x_ref, scale_ref, shift_ref, o_ref):
    x = x_ref[...].astype(jnp.float32)
    o_ref[...] = jnp.maximum(x * scale_ref[...] + shift_ref[...], 0.0)


def _pick_tile(total, cap, mult=8):
    """Largest tile <= cap dividing `total`, preferring multiples of `mult`
    (sublane packing); falls back to a multiple of 8, then the full extent."""
    cap = int(max(1, min(cap, total)))
    fallback = None
    for t in range(cap, 0, -1):
        if total % t:
            continue
        if t % mult == 0:
            return t
        if fallback is None and t % 8 == 0:
            fallback = t
    return fallback if fallback is not None else total


@partial(jax.jit, static_argnames=("upscale_factor", "eps"))
def duc_forward(x_nchw, conv_w, conv_b, bn_gamma, bn_beta,
                upscale_factor=4, eps=1e-5):
    # Training-mode BN subtracts the batch mean, so the conv bias cancels
    # exactly. (This is NOT true for eval-mode BN with running stats.)
    del conv_b
    N, Cin, H, W = x_nchw.shape
    Cout = conv_w.shape[0]
    r = upscale_factor
    assert Cout % (r * r) == 0
    C = Cout // (r * r)

    # ---- wrapper-side im2col in bf16: patches (N, H*W, 9*Cin), matmul-ready.
    # TODO(synk): for Cin >> 16, replace with in-kernel halo row-band tiling so
    # the 9x-wide patches tensor is never materialized in HBM.
    x_nhwc = jnp.transpose(x_nchw, (0, 2, 3, 1)).astype(jnp.bfloat16)
    x_pad = jnp.pad(x_nhwc, ((0, 0), (1, 1), (1, 1), (0, 0)))
    taps = [x_pad[:, dy:dy + H, dx:dx + W, :]
            for dy in range(3) for dx in range(3)]
    patches = jnp.concatenate(taps, axis=-1).reshape(N, H * W, 9 * Cin)

    K = 9 * Cin
    Kp = -(-K // 8) * 8          # pad contraction dim to a sublane multiple only
    if Kp != K:                  # (no padding toward 128/256: op is HBM-bound)
        patches = jnp.pad(patches, ((0, 0), (0, 0), (0, Kp - K)))
    w2d = jnp.transpose(conv_w, (2, 3, 1, 0)).reshape(K, Cout).astype(jnp.bfloat16)
    if Kp != K:
        w2d = jnp.pad(w2d, ((0, Kp - K), (0, 0)))

    # ---- conv + packed BN partial stats (one matmul per (image, row-tile)) ---
    conv_bytes_per_row = 2 * (Kp * 2 + Cout * 2)        # bf16 in + bf16 out, x2 bufs
    tm_cap = min(_VMEM_BLOCK_BUDGET // conv_bytes_per_row, 2048)
    if N == 1:                            # keep >= 2 grid programs for v7x 2 TCs
        tm_cap = min(tm_cap, max(H * W // 2, 1))
    TM = _pick_tile(H * W, tm_cap, mult=16)             # 16: bf16 sublane packing
    MT = (H * W) // TM

    conv_out, stats = pl.pallas_call(
        conv_stats_kernel,
        out_shape=(
            jax.ShapeDtypeStruct((N, H * W, Cout), jnp.bfloat16),
            jax.ShapeDtypeStruct((N, MT, 2, Cout), jnp.float32),
        ),
        grid=(N, MT),
        in_specs=[
            pl.BlockSpec((1, TM, Kp), lambda n, m: (n, m, 0)),
            pl.BlockSpec((Kp, Cout), lambda n, m: (0, 0)),
        ],
        out_specs=(
            pl.BlockSpec((1, TM, Cout), lambda n, m: (n, m, 0)),
            pl.BlockSpec((1, 1, 2, Cout), lambda n, m: (n, m, 0, 0)),
        ),
        compiler_params=pltpu.CompilerParams(
            dimension_semantics=("parallel", "parallel"),
            vmem_limit_bytes=_VMEM_LIMIT),
    )(patches, w2d)

    # ---- tiny scalar math for BN (no HBM re-read of conv_out) ----
    # TODO(synk): E[x^2]-E[x]^2 can cancel for huge counts / large |mean|; use
    # per-tile centered (Welford-style) partial stats if that regime matters.
    cnt = jnp.float32(N * H * W)
    tot = jnp.sum(stats, axis=(0, 1))                    # (2, Cout)
    mean = tot[0] / cnt
    var = jnp.maximum(tot[1] / cnt - mean * mean, 0.0)   # biased var == PyTorch
    scale = bn_gamma.astype(jnp.float32) / jnp.sqrt(var + eps)
    shift = bn_beta.astype(jnp.float32) - mean * scale

    # ---- fused BN affine + ReLU on a lane-dense (rows, W*Cout) view ----
    rows = N * H
    WC = W * Cout                       # multiple of 128 here -> unmasked stores
    x2d = conv_out.reshape(rows, WC)    # free contiguous reshape
    scale_t = jnp.tile(scale, W).reshape(1, WC)
    shift_t = jnp.tile(shift, W).reshape(1, WC)

    bnr_bytes_per_row = 2 * (WC * 2 + WC * 4)   # bf16 in + f32 out, x2 buffers
    tr_cap = min(max(_VMEM_BLOCK_BUDGET // bnr_bytes_per_row, 1), 2048)
    if rows > 1:                        # keep >= 2 grid programs for v7x 2 TCs
        tr_cap = min(tr_cap, max(rows // 2, 1))
    TR = _pick_tile(rows, tr_cap, mult=16)

    y2d = pl.pallas_call(
        bn_relu_kernel,
        out_shape=jax.ShapeDtypeStruct((rows, WC), jnp.float32),
        grid=(rows // TR,),
        in_specs=[
            pl.BlockSpec((TR, WC), lambda i: (i, 0)),
            pl.BlockSpec((1, WC), lambda i: (0, 0)),
            pl.BlockSpec((1, WC), lambda i: (0, 0)),
        ],
        out_specs=pl.BlockSpec((TR, WC), lambda i: (i, 0)),
        compiler_params=pltpu.CompilerParams(
            dimension_semantics=("parallel",),
            vmem_limit_bytes=_VMEM_LIMIT),
    )(x2d, scale_t, shift_t)

    # ---- PixelShuffle: pure layout plumbing, left to XLA ----
    # TODO(synk): fusing the shuffle into bn_relu's output needs a sub-vreg
    # (width-r) lane interleave of w and the channel sub-index; Mosaic does not
    # lower that relayout cleanly, so the transpose stays in XLA (costs one
    # extra HBM round trip of the final output).
    y = y2d.reshape(N, H, W, C, r, r)
    y = jnp.transpose(y, (0, 3, 1, 4, 2, 5))       # (N, C, H, r, W, r)
    return y.reshape(N, C, H * r, W * r)           # NCHW, matches PyTorch


# ---------------------------------------------------------------------------
# Pure-JAX f32 reference (mirrors the PyTorch forward, incl. conv bias).
# ---------------------------------------------------------------------------
def duc_reference(x, w, b, gamma, beta, r, eps=1e-5):
    conv = jax.lax.conv_general_dilated(
        x, w, window_strides=(1, 1), padding=((1, 1), (1, 1)),
        dimension_numbers=("NCHW", "OIHW", "NCHW"))
    conv = conv + b.reshape(1, -1, 1, 1)
    mean = conv.mean(axis=(0, 2, 3), keepdims=True)
    var = conv.var(axis=(0, 2, 3), keepdims=True)
    y = (conv - mean) / jnp.sqrt(var + eps)
    y = y * gamma.reshape(1, -1, 1, 1) + beta.reshape(1, -1, 1, 1)
    y = jnp.maximum(y, 0.0)
    N, C2, H, W = y.shape
    C = C2 // (r * r)
    y = y.reshape(N, C, r, r, H, W)
    y = jnp.transpose(y, (0, 1, 4, 2, 5, 3))
    return y.reshape(N, C, H * r, W * r)


if __name__ == "__main__":
    key = jax.random.PRNGKey(0)
    k1, k2, k3 = jax.random.split(key, 3)

    # DUC(in_channels=4, out_channels=32, upscale_factor=4)
    N, Cin, H, W = 2, 4, 16, 16
    r = 4
    Cout = 32                      # divisible by r*r = 16

    x = jax.random.normal(k1, (N, Cin, H, W), jnp.float32)
    conv_w = 0.1 * jax.random.normal(k2, (Cout, Cin, 3, 3), jnp.float32)
    conv_b = 0.1 * jax.random.normal(k3, (Cout,), jnp.float32)
    bn_gamma = jnp.ones((Cout,), jnp.float32)   # PyTorch BatchNorm2d default init
    bn_beta = jnp.zeros((Cout,), jnp.float32)

    out = duc_forward(x, conv_w, conv_b, bn_gamma, bn_beta, upscale_factor=r)
    out = jax.block_until_ready(out)

    ref = duc_reference(x, conv_w, conv_b, bn_gamma, bn_beta, r)
    assert out.shape == (N, Cout // (r * r), H * r, W * r), out.shape
    # Tolerance sized for bf16 matmul operands + bf16 conv_out storage
    # (f32 accumulation and f32 BN affine).
    np.testing.assert_allclose(np.asarray(out), np.asarray(ref),
                               atol=3e-2, rtol=3e-2)
    print("KERNEL_OK")
</pallas_src>

<mosaic_0001>
module attributes {stable_mosaic.version = 11 : i64} {
  func.func @conv_stats_kernel(%arg0: i32, %arg1: i32, %arg2: memref<1x256x40xbf16, #tpu.memory_space<vmem>>, %arg3: memref<40x32xbf16, #tpu.memory_space<vmem>>, %arg4: memref<1x256x32xbf16, #tpu.memory_space<vmem>>, %arg5: memref<1x1x2x32xf32, #tpu.memory_space<vmem>>) attributes {dimension_semantics = [#tpu.dimension_semantics<parallel>, #tpu.dimension_semantics<parallel>], iteration_bounds = array<i64: 2, 1>, scalar_prefetch = 0 : i64, scratch_operands = 0 : i64, tpu.core_type = #tpu.core_type<tc>, window_params = [{transform_indices = @transform_0, window_bounds = array<i64: 1, 256, 40>}, {pipeline_mode = #tpu.pipeline_mode<synchronous>, transform_indices = @transform_1, window_bounds = array<i64: 40, 32>}, {transform_indices = @transform_2, window_bounds = array<i64: 1, 256, 32>}, {transform_indices = @transform_3, window_bounds = array<i64: 1, 1, 2, 32>}]} {
    %c0 = arith.constant 0 : index
    %c0_0 = arith.constant 0 : index
    %c0_1 = arith.constant 0 : index
    %0 = vector.load %arg2[%c0, %c0_0, %c0_1] : memref<1x256x40xbf16, #tpu.memory_space<vmem>>, vector<1x256x40xbf16>
    %1 = vector.shape_cast %0 : vector<1x256x40xbf16> to vector<256x40xbf16>
    %c0_2 = arith.constant 0 : index
    %c0_3 = arith.constant 0 : index
    %2 = vector.load %arg3[%c0_2, %c0_3] : memref<40x32xbf16, #tpu.memory_space<vmem>>, vector<40x32xbf16>
    %cst = arith.constant dense<0.000000e+00> : vector<256x32xf32>
    %3 = tpu.matmul %1, %2, %cst {dimension_numbers = #tpu.dot_dimension_numbers<[1], [0], [0], [1], [0, 0, 1, 1], [], []>} : vector<256x40xbf16>, vector<40x32xbf16>, vector<256x32xf32> -> vector<256x32xf32>
    %4 = arith.truncf %3 : vector<256x32xf32> to vector<256x32xbf16>
    %5 = vector.shape_cast %4 : vector<256x32xbf16> to vector<1x256x32xbf16>
    %c0_4 = arith.constant 0 : index
    %c0_5 = arith.constant 0 : index
    %c0_6 = arith.constant 0 : index
    %6 = vector.load %arg4[%c0_4, %c0_5, %c0_6] : memref<1x256x32xbf16, #tpu.memory_space<vmem>>, vector<1x256x32xbf16>
    tpu.vector_store %arg4[%c0_4, %c0_5, %c0_6], %5 {strides = array<i32>} : memref<1x256x32xbf16, #tpu.memory_space<vmem>>, vector<1x256x32xbf16>,
    %cst_7 = arith.constant dense<0.000000e+00> : vector<32xf32>
    %7 = vector.multi_reduction <add>, %3, %cst_7 [0] : vector<256x32xf32> to vector<32xf32>
    %8 = vector.shape_cast %7 : vector<32xf32> to vector<1x32xf32>
    %c0_8 = arith.constant 0 : index
    %c0_9 = arith.constant 0 : index
    %c0_10 = arith.constant 0 : index
    %c0_11 = arith.constant 0 : index
    %9 = vector.load %arg5[%c0_8, %c0_9, %c0_10, %c0_11] : memref<1x1x2x32xf32, #tpu.memory_space<vmem>>, vector<1x1x1x32xf32>
    %10 = vector.shape_cast %9 : vector<1x1x1x32xf32> to vector<1x32xf32>
    %11 = vector.shape_cast %8 : vector<1x32xf32> to vector<1x1x1x32xf32>
    tpu.vector_store %arg5[%c0_8, %c0_9, %c0_10, %c0_11], %11 {strides = array<i32>} : memref<1x1x2x32xf32, #tpu.memory_space<vmem>>, vector<1x1x1x32xf32>,
    %12 = arith.mulf %3, %3 : vector<256x32xf32>
    %cst_12 = arith.constant dense<0.000000e+00> : vector<32xf32>
    %13 = vector.multi_reduction <add>, %12, %cst_12 [0] : vector<256x32xf32> to vector<32xf32>
    %14 = vector.shape_cast %13 : vector<32xf32> to vector<1x32xf32>
    %c0_13 = arith.constant 0 : index
    %c0_14 = arith.constant 0 : index
    %c1 = arith.constant 1 : index
    %c0_15 = arith.constant 0 : index
    %15 = vector.load %arg5[%c0_13, %c0_14, %c1, %c0_15] : memref<1x1x2x32xf32, #tpu.memory_space<vmem>>, vector<1x1x1x32xf32>
    %16 = vector.shape_cast %15 : vector<1x1x1x32xf32> to vector<1x32xf32>
    %17 = vector.shape_cast %14 : vector<1x32xf32> to vector<1x1x1x32xf32>
    tpu.vector_store %arg5[%c0_13, %c0_14, %c1, %c0_15], %17 {strides = array<i32>} : memref<1x1x2x32xf32, #tpu.memory_space<vmem>>, vector<1x1x1x32xf32>,
    return
  }
  func.func @transform_0(%arg0: i32, %arg1: i32) -> (i32, i32, i32) {
    %c0_i32 = arith.constant 0 : i32
    %c0_i32_0 = arith.constant 0 : i32
    return %arg0, %arg1, %c0_i32 : i32, i32, i32
  }
  func.func @transform_1(%arg0: i32, %arg1: i32) -> (i32, i32) {
    %c0_i32 = arith.constant 0 : i32
    %c0_i32_0 = arith.constant 0 : i32
    %c0_i32_1 = arith.constant 0 : i32
    return %c0_i32, %c0_i32_0 : i32, i32
  }
  func.func @transform_2(%arg0: i32, %arg1: i32) -> (i32, i32, i32) {
    %c0_i32 = arith.constant 0 : i32
    %c0_i32_0 = arith.constant 0 : i32
    return %arg0, %arg1, %c0_i32 : i32, i32, i32
  }
  func.func @transform_3(%arg0: i32, %arg1: i32) -> (i32, i32, i32, i32) {
    %c0_i32 = arith.constant 0 : i32
    %c0_i32_0 = arith.constant 0 : i32
    %c0_i32_1 = arith.constant 0 : i32
    return %arg0, %arg1, %c0_i32, %c0_i32_0 : i32, i32, i32, i32
  }
}

module attributes {stable_mosaic.version = 11 : i64} {
  func.func @bn_relu_kernel(%arg0: i32, %arg1: memref<16x512xbf16, #tpu.memory_space<vmem>>, %arg2: memref<1x512xf32, #tpu.memory_space<vmem>>, %arg3: memref<1x512xf32, #tpu.memory_space<vmem>>, %arg4: memref<16x512xf32, #tpu.memory_space<vmem>>) attributes {dimension_semantics = [#tpu.dimension_semantics<parallel>], iteration_bounds = array<i64: 2>, scalar_prefetch = 0 : i64, scratch_operands = 0 : i64, tpu.core_type = #tpu.core_type<tc>, window_params = [{transform_indices = @transform_0, window_bounds = array<i64: 16, 512>}, {pipeline_mode = #tpu.pipeline_mode<synchronous>, transform_indices = @transform_1, window_bounds = array<i64: 1, 512>}, {pipeline_mode = #tpu.pipeline_mode<synchronous>, transform_indices = @transform_2, window_bounds = array<i64: 1, 512>}, {transform_indices = @transform_3, window_bounds = array<i64: 16, 512>}]} {
    %c0 = arith.constant 0 : index
    %c0_0 = arith.constant 0 : index
    %0 = vector.load %arg1[%c0, %c0_0] : memref<16x512xbf16, #tpu.memory_space<vmem>>, vector<16x512xbf16>
    %1 = arith.extf %0 : vector<16x512xbf16> to vector<16x512xf32>
    %c0_1 = arith.constant 0 : index
    %c0_2 = arith.constant 0 : index
    %2 = vector.load %arg2[%c0_1, %c0_2] : memref<1x512xf32, #tpu.memory_space<vmem>>, vector<1x512xf32>
    %3 = vector.broadcast %2 : vector<1x512xf32> to vector<16x512xf32>
    %4 = arith.mulf %1, %3 : vector<16x512xf32>
    %c0_3 = arith.constant 0 : index
    %c0_4 = arith.constant 0 : index
    %5 = vector.load %arg3[%c0_3, %c0_4] : memref<1x512xf32, #tpu.memory_space<vmem>>, vector<1x512xf32>
    %6 = vector.broadcast %5 : vector<1x512xf32> to vector<16x512xf32>
    %7 = arith.addf %4, %6 : vector<16x512xf32>
    %cst = arith.constant 0.000000e+00 : f32
    %8 = vector.broadcast %cst : f32 to vector<16x512xf32>
    %9 = arith.maximumf %7, %8 : vector<16x512xf32>
    %c0_5 = arith.constant 0 : index
    %c0_6 = arith.constant 0 : index
    %10 = vector.load %arg4[%c0_5, %c0_6] : memref<16x512xf32, #tpu.memory_space<vmem>>, vector<16x512xf32>
    tpu.vector_store %arg4[%c0_5, %c0_6], %9 {strides = array<i32>} : memref<16x512xf32, #tpu.memory_space<vmem>>, vector<16x512xf32>,
    return
  }
  func.func @transform_0(%arg0: i32) -> (i32, i32) {
    %c0_i32 = arith.constant 0 : i32
    %c0_i32_0 = arith.constant 0 : i32
    return %arg0, %c0_i32 : i32, i32
  }
  func.func @transform_1(%arg0: i32) -> (i32, i32) {
    %c0_i32 = arith.constant 0 : i32
    %c0_i32_0 = arith.constant 0 : i32
    %c0_i32_1 = arith.constant 0 : i32
    return %c0_i32, %c0_i32_0 : i32, i32
  }
  func.func @transform_2(%arg0: i32) -> (i32, i32) {
    %c0_i32 = arith.constant 0 : i32
    %c0_i32_0 = arith.constant 0 : i32
    %c0_i32_1 = arith.constant 0 : i32
    return %c0_i32, %c0_i32_0 : i32, i32
  }
  func.func @transform_3(%arg0: i32) -> (i32, i32) {
    %c0_i32 = arith.constant 0 : i32
    %c0_i32_0 = arith.constant 0 : i32
    return %arg0, %c0_i32 : i32, i32
  }
}

</mosaic_0001>

<bundles_post_ra>
// kernel: tile.18
= control target key start
LH: loop header
LB: loop body
LE: loop exit
PB: predicated region body
PF: predicated region fallthrough
CT: control target
= control target key end

     0   :  { %s28_s0 = inlined_call_operand.vmem [shape: f32[32], index: 0, kind: input, shape index: {}]   ;;  %s29_s1 = inlined_call_operand.vmem [shape: f32[16,32], index: 1, kind: output, shape index: {}]  }
   0x1   :  { %v4_v0 = vld [vmem:[%s28_s0] ss:$0 sm:$0xff] }
   0x2   :  { %5 = vst [vmem:[%s29_s1] sm:$0xff] %v4_v0  ;;  %8 = vst [vmem:[%s29_s1 + $0x8] sm:$0xff] %v4_v0 }

// kernel: tile.19
= control target key start
LH: loop header
LB: loop body
LE: loop exit
PB: predicated region body
PF: predicated region fallthrough
CT: control target
= control target key end

     0   :  { %s57_s8 = smov 96   ;;  %vm3_vm0 = vcmask 261120   ;;  %s59_s15 = smov 64   ;;  %vm9_vm1 = vcmask 1048320   ;;  %vm15_vm2 = vcmask 785920   ;;  %vm21_vm3 = vcmask 523520   ;;  %s94_s0 = inlined_call_operand.vmem [shape: f32[16,32], index: 0, kind: input, shape index: {}]   ;;  %s95_s1 = inlined_call_operand.vmem [shape: f32[1,512], index: 1, kind: output, shape index: {}]  }
   0x1   :  { %v48_v0 = vld [vmem:[%s94_s0 + $0x3] ss:$4 sm:$0xf]   ;;  %v49_v1 = vld [vmem:[%s94_s0 + $0x2] ss:$4 sm:$0xf]  }
   0x2   :  { %7 = vrot.lane.b32.xlu0 %v48_v0, %s57_s8  ;;  %v50_v2 = vld [vmem:[%s94_s0 + $0x1] ss:$4 sm:$0xf]   ;;  %v2_v3 = vld [vmem:[%s94_s0] ss:$4 sm:$0xf]  }
   0x3   :  { %s58_s0 = smov 32   ;;  %4 = vst.msk [vmem:[#allocation0] ss:$8 sm:$0xf] %vm3_vm0, %v2_v3  }
   0x4   :  { %19 = vrot.lane.b32.xlu1 %v50_v2, %s58_s0 }
   0x6   :  { %13 = vrot.lane.b32.xlu0 %v49_v1, %s59_s15 }
  0x74   :  { %v8_v4 = vpop.permute.xlu0 %7  }
  0x75   :  { %10 = vst.msk [vmem:[#allocation0] ss:$8 sm:$0xf] %vm9_vm1, %v8_v4  }
  0x76   :  { %v20_v5 = vpop.permute.xlu1 %19  }
  0x78   :  { %v14_v6 = vpop.permute.xlu0 %13  }
  0x79   :  { %16 = vst.msk [vmem:[#allocation0] ss:$8 sm:$0xf] %vm15_vm2, %v14_v6  }
  0x7a   :  { %22 = vst.msk [vmem:[#allocation0] ss:$8 sm:$0xf] %vm21_vm3, %v20_v5  }
  0x81   :  { %v26_v7 = vld [vmem:[#allocation0] sm:$0x1]  ;;  %v30_v8 = vld [vmem:[#allocation0 + $0x8] sm:$0x1]  ;;  %v35_v9 = vld [vmem:[#allocation0 + $0x10] sm:$0x1] }
  0x82   :  { %28 = vst [vmem:[%s95_s1] sm:$0x1] %v26_v7  ;;  %51 = vst [vmem:[%s95_s1 + $0x1] sm:$0x1] %v30_v8  ;;  %v41_v10 = vld [vmem:[#allocation0 + $0x18] sm:$0x1] }
  0x83   :  { %52 = vst [vmem:[%s95_s1 + $0x2] sm:$0x1] %v35_v9  ;;  %53 = vst [vmem:[%s95_s1 + $0x3] sm:$0x1] %v41_v10 }

// kernel: duc_forward.3
= control target key start
LH: loop header
LB: loop body
LE: loop exit
PB: predicated region body
PF: predicated region fallthrough
CT: control target
= control target key end

     0   :  { %s376_s12 = smov 0   ;;  %s403_s0 = inlined_call_operand.vmem [shape: bf16[32,512], index: 0, kind: input, shape index: {}]   ;;  %s404_s1 = inlined_call_operand.vmem [shape: f32[1,512], index: 1, kind: input, shape index: {}]   ;;  %s405_s2 = inlined_call_operand.vmem [shape: f32[1,512], index: 2, kind: input, shape index: {}]   ;;  %s406_s3 = inlined_call_operand.vmem [shape: f32[32,512], index: 3, kind: output, shape index: {}]  }
   0x1 LB: > { %s325_s13 = sadd.s32 4294967295, %s354_s12   ;;  %p329_p0 = scmp.ge.s32.totalorder %s354_s12, 1  ;;  %s354_s12 = sphi %s376_s12, %s13_s12  }
   0x2   : > { %p139_p1 = scmp.lt.s32.totalorder %s354_s12, 3 }
   0x4   : > { %p140_p2 = pnand %p329_p0, %p139_p1 }
   0x5   : > { %s330_s14 = sshll.u32 (!%p140_p2), %s325_s13, 1  ;;  %v193_v0 = vlaneseq (!%p140_p2)  ;;  %v191_v2 = vld [vmem:[%s404_s1] sm:$0xf] (!%p140_p2) }
   0x6   : > { %143 = sbr.rel (%p140_p2) target bundleno = 29 (0x1d), region = 32  ;;  %p166_p3 = scmp.lt.s32.totalorder (!%p140_p2), %s330_s14, 3  ;;  %v221_v3 = vld [vmem:[%s405_s2] sm:$0xf] (!%p140_p2) }
   0x7   : > { %v194_v1 = vshrl.u32 (!%p140_p2), %v193_v0, 7 }
   0x9   : > { %v195_v4 = vsub.s32 (!%p140_p2), 0, %v194_v1  ;;  %v199_v5 = vsub.s32 (!%p140_p2), 1, %v194_v1  ;;  %v203_v6 = vsub.s32 (!%p140_p2), 2, %v194_v1  ;;  %v207_v7 = vsub.s32 (!%p140_p2), 3, %v194_v1 }
   0xb   : > { %v196_v8 = vrot.slane (!%p140_p2), %v191_v2, %v195_v4  ;;  %v226_v9 = vrot.slane (!%p140_p2), %v221_v3, %v195_v4  ;;  %v200_v10 = vrot.slane (!%p140_p2), %v191_v2, %v199_v5  ;;  %v230_v11 = vrot.slane (!%p140_p2), %v221_v3, %v199_v5 }
   0xc   : > { %v204_v14 = vrot.slane (!%p140_p2), %v191_v2, %v203_v6  ;;  %v234_v15 = vrot.slane (!%p140_p2), %v221_v3, %v203_v6  ;;  %v208_v16 = vrot.slane (!%p140_p2), %v191_v2, %v207_v7  ;;  %v238_v17 = vrot.slane (!%p140_p2), %v221_v3, %v207_v7 }
   0xd   : > { %s408_s14 = smov (!%p166_p3, %s330_s14), 3 }
   0xe   : > { %s338_s19 = sshll.u32 %s408_s14, 4  ;;  %s339_s23 = sshll.u32 %s408_s14, 5 }
   0xf   : > { %s170_s22 = scalar_lea.vmem %s403_s0, %s338_s19  ;;  %s177_s26 = scalar_lea.vmem %s406_s3, %s339_s23 }
  0x10   : > { %v179_v12 = vld [vmem:[%s170_s22] sm:$0xff]  ;;  %v180_v13 = vld [vmem:[%s170_s22 + $0x8] sm:$0xff]  ;;  %v181_v18 = vld [vmem:[%s170_s22 + $0x10] sm:$0xff] }
  0x11   : > { %v183_v19 = vunpack.c.l.bf16 %v179_v12  ;;  %v184_v20 = vunpack.c.h.bf16 %v179_v12  ;;  %v185_v21 = vunpack.c.l.bf16 %v180_v13  ;;  %v186_v22 = vunpack.c.h.bf16 %v180_v13  ;;  %v182_v23 = vld [vmem:[%s170_s22 + $0x18] sm:$0xff] }
  0x12   : > { %v187_v24 = vunpack.c.l.bf16 %v181_v18  ;;  %v188_v25 = vunpack.c.h.bf16 %v181_v18  ;;  %v189_v26 = vunpack.c.l.bf16 %v182_v23  ;;  %v190_v27 = vunpack.c.h.bf16 %v182_v23 }
  0x13   : > { %v213_v28 = vmul.f32 %v196_v8, %v183_v19  ;;  %v214_v29 = vmul.f32 %v200_v10, %v184_v20  ;;  %v215_v30 = vmul.f32 %v204_v14, %v185_v21  ;;  %v216_v31 = vmul.f32 %v208_v16, %v186_v22 }
  0x14   : > { %v217_v32 = vmul.f32 %v196_v8, %v187_v24  ;;  %v218_v33 = vmul.f32 %v200_v10, %v188_v25  ;;  %v219_v34 = vmul.f32 %v204_v14, %v189_v26  ;;  %v220_v35 = vmul.f32 %v208_v16, %v190_v27 }
  0x15   : > { %v243_v36 = vadd.f32 %v226_v9, %v213_v28  ;;  %v244_v37 = vadd.f32 %v230_v11, %v214_v29  ;;  %v245_v38 = vadd.f32 %v234_v15, %v215_v30  ;;  %v246_v39 = vadd.f32 %v238_v17, %v216_v31 }
  0x16   : > { %v247_v40 = vadd.f32 %v226_v9, %v217_v32  ;;  %v248_v41 = vadd.f32 %v230_v11, %v218_v33  ;;  %v249_v42 = vadd.f32 %v234_v15, %v219_v34  ;;  %v250_v43 = vadd.f32 %v238_v17, %v220_v35 }
  0x17   : > { %v251_v44 = vmax.f32 %v243_v36, 0.0  ;;  %v252_v45 = vmax.f32 %v244_v37, 0.0  ;;  %v253_v46 = vmax.f32 %v245_v38, 0.0  ;;  %v254_v47 = vmax.f32 %v246_v39, 0.0 }
  0x18   : > { %v255_v48 = vmax.f32 %v247_v40, 0.0  ;;  %v256_v49 = vmax.f32 %v248_v41, 0.0  ;;  %v257_v50 = vmax.f32 %v249_v42, 0.0  ;;  %v258_v51 = vmax.f32 %v250_v43, 0.0 }
  0x19   : > { %259 = vst [vmem:[%s177_s26] sm:$0xff] %v251_v44  ;;  %260 = vst [vmem:[%s177_s26 + $0x8] sm:$0xff] %v252_v45 }
  0x1a   : > { %261 = vst [vmem:[%s177_s26 + $0x10] sm:$0xff] %v253_v46  ;;  %262 = vst [vmem:[%s177_s26 + $0x18] sm:$0xff] %v254_v47 }
  0x1b   : > { %263 = vst [vmem:[%s177_s26 + $0x20] sm:$0xff] %v255_v48  ;;  %264 = vst [vmem:[%s177_s26 + $0x28] sm:$0xff] %v256_v49 }
  0x1c   : > { %265 = vst [vmem:[%s177_s26 + $0x30] sm:$0xff] %v257_v50  ;;  %266 = vst [vmem:[%s177_s26 + $0x38] sm:$0xff] %v258_v51 }
  0x1d PF: > { %s13_s12 = sadd.s32 1, %s354_s12  }
  0x1e   : > { %p10_p4 = scmp.ge.s32.totalorder %s13_s12, 4  }
  0x20   :  { %12 = sbr.rel (!%p10_p4) target bundleno = 1 (0x1), region = 62 }

// kernel: duc_forward.2
= control target key start
LH: loop header
LB: loop body
LE: loop exit
PB: predicated region body
PF: predicated region fallthrough
CT: control target
= control target key end

     0   :  { %s1304_s12 = smov 0   ;;  %s1306_s13 = smov 0   ;;  %s1633_s0 = inlined_call_operand.vmem [shape: bf16[2,256,40], index: 0, kind: input, shape index: {}]   ;;  %s1634_s1 = inlined_call_operand.vmem [shape: bf16[40,32], index: 1, kind: input, shape index: {}]   ;;  %s1635_s2 = inlined_call_operand.vmem [shape: bf16[2,256,32], index: 2, kind: output, shape index: {0}]   ;;  %s1636_s3 = inlined_call_operand.vmem [shape: f32[2,1,2,32], index: 3, kind: output, shape index: {1}]  }
   0x1   :  { %s1308_s14 = smov 0  }
   0x2 LB: > { %s26_s15 = sadd.s32 1, %s1278_s13  ;;  %p1043_p0 = scmp.ge.s32.totalorder %s1282_s14, 1  ;;  %s1282_s14 = sphi %s1308_s14, %s14_s14   ;;  %s1278_s13 = sphi %s1306_s13, %s1638_s13   ;;  %s1274_s12 = sphi %s1304_s12, %s1637_s12  }
   0x3   : > { %p28_p1 = scmp.ge.s32.totalorder %s26_s15, 2  ;;  %p163_p2 = scmp.lt.s32.totalorder %s1282_s14, 3 }
   0x5   : > { %s1640_s15 = smov (%p28_p1, %s26_s15), 0  ;;  %p164_p3 = pnand %p1043_p0, %p163_p2 }
   0x6   : > { %v1241_v0 = vld [vmem:[%s1634_s1] sm:$0xff] (!%p164_p3)   ;;  %v1242_v1 = vld [vmem:[%s1634_s1 + $0x8] sm:$0xff] (!%p164_p3)   ;;  %p203_p4 = scmp.lt.s32.totalorder (!%p164_p3), %s1274_s12, 1  ;;  %v1243_v2 = vld [vmem:[%s1634_s1 + $0x10] ss:$0 sps:$4 sm:$0xff] (!%p164_p3)   ;;  %vm411_vm0 = vcmask (!%p164_p3), 1043456  }
   0x7   : > { %167 = sbr.rel (%p164_p3) target bundleno = 312 (0x138), region = 28  ;;  %1171 = vmatprep.subr.bf16.mxu0 (!%p164_p3), %v1241_v0  ;;  %1209 = vmatprep.subr.bf16.mxu1 (!%p164_p3), %v1241_v0  ;;  %vm362_vm1 = vcmask (!%p164_p3), 326656   ;;  %v413_v4 = vsel (!%p164_p3), %vm411_vm0, %v1243_v2, 0  ;;  %vm704_vm2 = vcmask (!%p164_p3), 257024   ;;  %vm737_vm3 = vcmask (!%p164_p3), 261120  }
   0x8   : > { %1172 = vmatpush3.bf16.msra.mxu0 (!%p164_p3), %v1241_v0  ;;  %1212 = vmatpush3.bf16.msra.mxu1 (!%p164_p3), %v1241_v0  ;;  %vm807_vm4 = vcmask (!%p164_p3), 253952  }
   0x9   : > { %1173 = vmatprep.subr.bf16.mxu0 (!%p164_p3), %v1242_v1  ;;  %1210 = vmatprep.subr.bf16.mxu1 (!%p164_p3), %v1242_v1 }
   0xc   : > { %1174 = vmatpush3.bf16.msra.mxu0 (!%p164_p3), %v1242_v1  ;;  %1213 = vmatpush3.bf16.msra.mxu1 (!%p164_p3), %v1242_v1 }
   0xd   : > { %1215 = vmatprep.subr.msk.bf16.mxu0 (!%p164_p3), %vm411_vm0, %v1243_v2  ;;  %1216 = vmatprep.subr.msk.bf16.mxu1 (!%p164_p3), %vm411_vm0, %v1243_v2 }
   0xe   : > { %s1642_s12 = smov (!%p203_p4, %s1274_s12), 1 }
   0xf   : > { %s1118_s22 = sshll.u32 %s1642_s12, 7  ;;  %s1048_s29 = sshll.u32 %s1642_s12, 1 }
  0x10   : > { %s1339_s25 = scalar_lea.vmem %s1633_s0, %s1118_s22  ;;  %1176 = vmatpush3.bf16.msra.mxu0 %v413_v4  ;;  %1214 = vmatpush3.bf16.msra.mxu1 %v413_v4  ;;  %s1378_s28 = scalar_lea.vmem %s1635_s2, %s1118_s22 }
  0x11   : > { %v1244_v3 = vld [vmem:[%s1339_s25] sm:$0xff]   ;;  %v1245_v5 = vld [vmem:[%s1339_s25 + $0x8] sm:$0xff]   ;;  %v1246_v6 = vld [vmem:[%s1339_s25 + $0x10] sm:$0xff]   ;;  %s228_s5 = scalar_lea.vmem %s1636_s3, %s1048_s29 }
  0x12   : > { %1177 = vmatprep.mubr.msk.bf16.mxu0 %vm362_vm1, %v1244_v3  ;;  %v1252_v7 = vld [vmem:[%s1339_s25 + $0x40] sm:$0xff]   ;;  %v1253_v8 = vld [vmem:[%s1339_s25 + $0x48] sm:$0xff]   ;;  %v1254_v9 = vld [vmem:[%s1339_s25 + $0x50] sm:$0xff]  }
  0x13   : > { %1178 = vmatmul.mubr.msk.bf16.vlgmr.msra.gmra.mrb[0].mxu0 %vm362_vm1, %v1245_v5  ;;  %1193 = vmatprep.mubr.msk.bf16.mxu1 %vm362_vm1, %v1252_v7  ;;  %v1247_v10 = vld [vmem:[%s1339_s25 + $0x18] sm:$0xff]   ;;  %v1248_v11 = vld [vmem:[%s1339_s25 + $0x20] sm:$0xff]   ;;  %v1249_v14 = vld [vmem:[%s1339_s25 + $0x28] sm:$0xff]  }
  0x14   : > { %1181 = vmatprep.mubr.msk.bf16.mxu0 %vm362_vm1, %v1246_v6  ;;  %1194 = vmatmul.mubr.msk.bf16.vlgmr.msra.gmra.mrb[0].mxu1 %vm362_vm1, %v1253_v8  ;;  %v1255_v12 = vld [vmem:[%s1339_s25 + $0x58] sm:$0xff]   ;;  %v1256_v13 = vld [vmem:[%s1339_s25 + $0x60] sm:$0xff]   ;;  %v1250_v15 = vld [vmem:[%s1339_s25 + $0x30] sm:$0xff]  }
  0x15   : > { %1197 = vmatprep.mubr.msk.bf16.mxu1 %vm362_vm1, %v1254_v9  ;;  %v1257_v16 = vld [vmem:[%s1339_s25 + $0x68] sm:$0xff]   ;;  %v1258_v17 = vld [vmem:[%s1339_s25 + $0x70] sm:$0xff]   ;;  %v1251_v18 = vld [vmem:[%s1339_s25 + $0x38] sm:$0xff]  }
  0x16   : > { %v1259_v19 = vld [vmem:[%s1339_s25 + $0x78] sm:$0xff]  }
  0x1b   : > { %1182 = vmatmul.mubr.msk.bf16.gmra.mrb[4].mxu0 %vm362_vm1, %v1247_v10 }
  0x1c   : > { %1185 = vmatprep.mubr.msk.bf16.mxu0 %vm362_vm1, %v1248_v11  ;;  %1198 = vmatmul.mubr.msk.bf16.gmra.mrb[4].mxu1 %vm362_vm1, %v1255_v12 }
  0x1d   : > { %1201 = vmatprep.mubr.msk.bf16.mxu1 %vm362_vm1, %v1256_v13 }
  0x23   : > { %1186 = vmatmul.mubr.msk.bf16.gmra.mrb[8].mxu0 %vm362_vm1, %v1249_v14 }
  0x24   : > { %1189 = vmatprep.mubr.msk.bf16.mxu0 %vm362_vm1, %v1250_v15  ;;  %1202 = vmatmul.mubr.msk.bf16.gmra.mrb[8].mxu1 %vm362_vm1, %v1257_v16 }
  0x25   : > { %1205 = vmatprep.mubr.msk.bf16.mxu1 %vm362_vm1, %v1258_v17 }
  0x2b   : > { %1190 = vmatmul.mubr.msk.bf16.gmra.mrb[12].mxu0 %vm362_vm1, %v1251_v18 }
  0x2c   : > { %1206 = vmatmul.mubr.msk.bf16.gmra.mrb[12].mxu1 %vm362_vm1, %v1259_v19 }
  0xe6   : > { %v1179_v20 = vpop.f32.mrb[0].mxu0 }
  0xe7   : > { %v1122_v21 = vpack.c.bf16 %v1179_v20, %v1179_v20  ;;  %v449_v22 = vpop.f32.mrb[1].mxu0  ;;  %v811_v26 = vmul.f32 %v1179_v20, %v1179_v20  ;;  %v1386_v33 = vpop.f32.mrb[0].mxu1  ;;  %v741_v38 = vsel %vm737_vm3, %v1179_v20, 0.0 }
  0xe8   : > { %v1120_v23 = vpack.c.bf16 %v449_v22, %v449_v22  ;;  %v809_v24 = vmul.f32 %v449_v22, %v449_v22  ;;  %v1180_v25 = vpop.f32.mrb[2].mxu0  ;;  %v738_v29 = vsel %vm737_vm3, %v449_v22, 0.0  ;;  %v1138_v36 = vpack.c.bf16 %v1386_v33, %v1386_v33  ;;  %v1392_v37 = vpop.f32.mrb[1].mxu1 }
  0xe9   : > { %707 = vst.msk [vmem:[%s1378_s28 + $0x8] sm:$0xf] %vm704_vm2, %v1122_v21  ;;  %v1123_v27 = vpack.c.bf16 %v1180_v25, %v1180_v25  ;;  %v452_v28 = vpop.f32.mrb[3].mxu0  ;;  %v812_v34 = vmul.f32 %v1180_v25, %v1180_v25  ;;  %v1136_v41 = vpack.c.bf16 %v1392_v37, %v1392_v37  ;;  %v1401_v42 = vpop.f32.mrb[2].mxu1  ;;  %v844_v47 = vsel %vm737_vm3, %v811_v26, 0.0 }
  0xea   : > { %705 = vst.msk [vmem:[%s1378_s28] sm:$0xf] %vm704_vm2, %v1120_v23  ;;  %v1121_v30 = vpack.c.bf16 %v452_v28, %v452_v28  ;;  %v739_v31 = vsel %vm737_vm3, %v452_v28, 0.0  ;;  %v810_v32 = vmul.f32 %v452_v28, %v452_v28  ;;  %v841_v39 = vsel %vm737_vm3, %v809_v24, 0.0  ;;  %723 = vst.msk [vmem:[%s1378_s28 + $0x48] sm:$0xf] %vm704_vm2, %v1138_v36 }
  0xeb   : > { %708 = vst.msk [vmem:[%s1378_s28 + $0xc] sm:$0xf] %vm704_vm2, %v1123_v27  ;;  %v740_v35 = vadd.f32 %v739_v31, %v738_v29  ;;  %v1139_v45 = vpack.c.bf16 %v1401_v42, %v1401_v42  ;;  %v1407_v46 = vpop.f32.mrb[3].mxu1  ;;  %721 = vst.msk [vmem:[%s1378_s28 + $0x40] sm:$0xf] %vm704_vm2, %v1136_v41  ;;  %v743_v50 = vsel %vm737_vm3, %v1180_v25, 0.0 }
  0xec   : > { %706 = vst.msk [vmem:[%s1378_s28 + $0x4] sm:$0xf] %vm704_vm2, %v1121_v30  ;;  %v842_v40 = vsel %vm737_vm3, %v810_v32, 0.0  ;;  %v1137_v49 = vpack.c.bf16 %v1407_v46, %v1407_v46  ;;  %v846_v51 = vsel %vm737_vm3, %v812_v34, 0.0 }
  0xed   : > { %v742_v43 = vadd.f32 %v741_v38, %v740_v35  ;;  %v843_v44 = vadd.f32 %v842_v40, %v841_v39  ;;  %724 = vst.msk [vmem:[%s1378_s28 + $0x4c] sm:$0xf] %vm704_vm2, %v1139_v45 }
  0xee   : > { %v1183_v48 = vpop.f32.mrb[4].mxu0  ;;  %722 = vst.msk [vmem:[%s1378_s28 + $0x44] sm:$0xf] %vm704_vm2, %v1137_v49 }
  0xef   : > { %v845_v52 = vadd.f32 %v844_v47, %v843_v44  ;;  %v1126_v53 = vpack.c.bf16 %v1183_v48, %v1183_v48  ;;  %v465_v54 = vpop.f32.mrb[5].mxu0  ;;  %v744_v56 = vadd.f32 %v743_v50, %v742_v43  ;;  %v1426_v2 = vpop.f32.mrb[4].mxu1  ;;  %v815_v3 = vmul.f32 %v1183_v48, %v1183_v48 }
  0xf0   : > { %v1124_v55 = vpack.c.bf16 %v465_v54, %v465_v54  ;;  %v745_v57 = vsel %vm737_vm3, %v465_v54, 0.0  ;;  %v813_v58 = vmul.f32 %v465_v54, %v465_v54  ;;  %v1184_v59 = vpop.f32.mrb[6].mxu0  ;;  %v1431_v7 = vpop.f32.mrb[5].mxu1  ;;  %v749_v10 = vsel %vm737_vm3, %v1183_v48, 0.0 }
  0xf1   : > { %711 = vst.msk [vmem:[%s1378_s28 + $0x18] sm:$0xf] %vm704_vm2, %v1126_v53  ;;  %v847_v60 = vadd.f32 %v846_v51, %v845_v52  ;;  %v1127_v61 = vpack.c.bf16 %v1184_v59, %v1184_v59  ;;  %v468_v62 = vpop.f32.mrb[7].mxu0  ;;  %v746_v63 = vadd.f32 %v745_v57, %v744_v56  ;;  %v1435_v9 = vpop.f32.mrb[6].mxu1  ;;  %v816_v11 = vmul.f32 %v1184_v59, %v1184_v59 }
  0xf2   : > { %709 = vst.msk [vmem:[%s1378_s28 + $0x10] sm:$0xf] %vm704_vm2, %v1124_v55  ;;  %v848_v0 = vsel %vm737_vm3, %v813_v58, 0.0  ;;  %v1125_v1 = vpack.c.bf16 %v468_v62, %v468_v62  ;;  %v747_v5 = vsel %vm737_vm3, %v468_v62, 0.0  ;;  %v814_v6 = vmul.f32 %v468_v62, %v468_v62  ;;  %v1441_v14 = vpop.f32.mrb[7].mxu1 }
  0xf3   : > { %v849_v4 = vadd.f32 %v848_v0, %v847_v60  ;;  %712 = vst.msk [vmem:[%s1378_s28 + $0x1c] sm:$0xf] %vm704_vm2, %v1127_v61  ;;  %v748_v8 = vadd.f32 %v747_v5, %v746_v63  ;;  %v1142_v13 = vpack.c.bf16 %v1426_v2, %v1426_v2  ;;  %v1140_v18 = vpack.c.bf16 %v1431_v7, %v1431_v7 }
  0xf4   : > { %710 = vst.msk [vmem:[%s1378_s28 + $0x14] sm:$0xf] %vm704_vm2, %v1125_v1  ;;  %v850_v12 = vsel %vm737_vm3, %v814_v6, 0.0  ;;  %v852_v19 = vsel %vm737_vm3, %v815_v3, 0.0  ;;  %v751_v20 = vsel %vm737_vm3, %v1184_v59, 0.0  ;;  %v854_v28 = vsel %vm737_vm3, %v816_v11, 0.0 }
  0xf5   : > { %v750_v15 = vadd.f32 %v749_v10, %v748_v8  ;;  %v851_v16 = vadd.f32 %v850_v12, %v849_v4  ;;  %727 = vst.msk [vmem:[%s1378_s28 + $0x58] sm:$0xf] %vm704_vm2, %v1142_v13  ;;  %725 = vst.msk [vmem:[%s1378_s28 + $0x50] sm:$0xf] %vm704_vm2, %v1140_v18  ;;  %v1143_v51 = vpack.c.bf16 %v1435_v9, %v1435_v9 }
  0xf6   : > { %v1187_v17 = vpop.f32.mrb[8].mxu0  ;;  %v1141_v56 = vpack.c.bf16 %v1441_v14, %v1441_v14 }
  0xf7   : > { %v1130_v21 = vpack.c.bf16 %v1187_v17, %v1187_v17  ;;  %v481_v22 = vpop.f32.mrb[9].mxu0  ;;  %v853_v23 = vadd.f32 %v852_v19, %v851_v16  ;;  %v752_v25 = vadd.f32 %v751_v20, %v750_v15  ;;  %v1457_v36 = vpop.f32.mrb[8].mxu1  ;;  %v819_v38 = vmul.f32 %v1187_v17, %v1187_v17  ;;  %728 = vst.msk [vmem:[%s1378_s28 + $0x5c] sm:$0xf] %vm704_vm2, %v1143_v51 }
  0xf8   : > { %v1128_v24 = vpack.c.bf16 %v481_v22, %v481_v22  ;;  %v753_v26 = vsel %vm737_vm3, %v481_v22, 0.0  ;;  %v1188_v27 = vpop.f32.mrb[10].mxu0  ;;  %v817_v29 = vmul.f32 %v481_v22, %v481_v22  ;;  %v1463_v43 = vpop.f32.mrb[9].mxu1  ;;  %v757_v48 = vsel %vm737_vm3, %v1187_v17, 0.0  ;;  %726 = vst.msk [vmem:[%s1378_s28 + $0x54] sm:$0xf] %vm704_vm2, %v1141_v56 }
  0xf9   : > { %715 = vst.msk [vmem:[%s1378_s28 + $0x28] sm:$0xf] %vm704_vm2, %v1130_v21  ;;  %v1131_v30 = vpack.c.bf16 %v1188_v27, %v1188_v27  ;;  %v484_v31 = vpop.f32.mrb[11].mxu0  ;;  %v754_v32 = vadd.f32 %v753_v26, %v752_v25  ;;  %v855_v34 = vadd.f32 %v854_v28, %v853_v23  ;;  %v1467_v47 = vpop.f32.mrb[10].mxu1  ;;  %v820_v49 = vmul.f32 %v1188_v27, %v1188_v27 }
  0xfa   : > { %713 = vst.msk [vmem:[%s1378_s28 + $0x20] sm:$0xf] %vm704_vm2, %v1128_v24  ;;  %v1129_v35 = vpack.c.bf16 %v484_v31, %v484_v31  ;;  %v856_v39 = vsel %vm737_vm3, %v817_v29, 0.0  ;;  %v755_v40 = vsel %vm737_vm3, %v484_v31, 0.0  ;;  %v818_v41 = vmul.f32 %v484_v31, %v484_v31  ;;  %v1473_v52 = vpop.f32.mrb[11].mxu1 }
  0xfb   : > { %716 = vst.msk [vmem:[%s1378_s28 + $0x2c] sm:$0xf] %vm704_vm2, %v1131_v30  ;;  %v857_v44 = vadd.f32 %v856_v39, %v855_v34  ;;  %v756_v45 = vadd.f32 %v755_v40, %v754_v32  ;;  %v860_v57 = vsel %vm737_vm3, %v819_v38, 0.0  ;;  %v759_v58 = vsel %vm737_vm3, %v1188_v27, 0.0 }
  0xfc   : > { %714 = vst.msk [vmem:[%s1378_s28 + $0x24] sm:$0xf] %vm704_vm2, %v1129_v35  ;;  %v858_v50 = vsel %vm737_vm3, %v818_v41, 0.0  ;;  %v862_v3 = vsel %vm737_vm3, %v820_v49, 0.0  ;;  %v825_v21 = vmul.f32 %v1392_v37, %v1392_v37  ;;  %v1146_v26 = vpack.c.bf16 %v1457_v36, %v1457_v36 }
  0xfd   : > { %v758_v53 = vadd.f32 %v757_v48, %v756_v45  ;;  %v859_v54 = vadd.f32 %v858_v50, %v857_v44  ;;  %v1144_v30 = vpack.c.bf16 %v1463_v43, %v1463_v43  ;;  %v769_v34 = vsel %vm737_vm3, %v1392_v37, 0.0 }
  0xfe   : > { %v1191_v55 = vpop.f32.mrb[12].mxu0  ;;  %731 = vst.msk [vmem:[%s1378_s28 + $0x68] sm:$0xf] %vm704_vm2, %v1146_v26  ;;  %v1147_v35 = vpack.c.bf16 %v1467_v47, %v1467_v47  ;;  %v872_v41 = vsel %vm737_vm3, %v825_v21, 0.0  ;;  %v826_v44 = vmul.f32 %v1407_v46, %v1407_v46  ;;  %v1145_v37 = vpack.c.bf16 %v1473_v52, %v1473_v52 }
  0xff   : > { %v1134_v59 = vpack.c.bf16 %v1191_v55, %v1191_v55  ;;  %v497_v60 = vpop.f32.mrb[13].mxu0  ;;  %v861_v61 = vadd.f32 %v860_v57, %v859_v54  ;;  %v760_v63 = vadd.f32 %v759_v58, %v758_v53  ;;  %v1489_v12 = vpop.f32.mrb[12].mxu1  ;;  %v823_v13 = vmul.f32 %v1191_v55, %v1191_v55  ;;  %729 = vst.msk [vmem:[%s1378_s28 + $0x60] sm:$0xf] %vm704_vm2, %v1144_v30 }
 0x100   : > { %v1132_v62 = vpack.c.bf16 %v497_v60, %v497_v60  ;;  %v761_v0 = vsel %vm737_vm3, %v497_v60, 0.0  ;;  %v1192_v1 = vpop.f32.mrb[14].mxu0  ;;  %v821_v4 = vmul.f32 %v497_v60, %v497_v60  ;;  %v1495_v18 = vpop.f32.mrb[13].mxu1  ;;  %v765_v23 = vsel %vm737_vm3, %v1191_v55, 0.0  ;;  %732 = vst.msk [vmem:[%s1378_s28 + $0x6c] sm:$0xf] %vm704_vm2, %v1147_v35 }
 0x101   : > { %719 = vst.msk [vmem:[%s1378_s28 + $0x38] sm:$0xf] %vm704_vm2, %v1134_v59  ;;  %v1135_v5 = vpack.c.bf16 %v1192_v1, %v1192_v1  ;;  %v500_v6 = vpop.f32.mrb[15].mxu0  ;;  %v762_v8 = vadd.f32 %v761_v0, %v760_v63  ;;  %v863_v10 = vadd.f32 %v862_v3, %v861_v61  ;;  %v1501_v22 = vpop.f32.mrb[14].mxu1  ;;  %v824_v24 = vmul.f32 %v1192_v1, %v1192_v1 }
 0x102   : > { %717 = vst.msk [vmem:[%s1378_s28 + $0x30] sm:$0xf] %vm704_vm2, %v1132_v62  ;;  %v1133_v11 = vpack.c.bf16 %v500_v6, %v500_v6  ;;  %v864_v15 = vsel %vm737_vm3, %v821_v4, 0.0  ;;  %v763_v16 = vsel %vm737_vm3, %v500_v6, 0.0  ;;  %v822_v17 = vmul.f32 %v500_v6, %v500_v6  ;;  %v1507_v27 = vpop.f32.mrb[15].mxu1 }
 0x103   : > { %720 = vst.msk [vmem:[%s1378_s28 + $0x3c] sm:$0xf] %vm704_vm2, %v1135_v5  ;;  %v865_v19 = vadd.f32 %v864_v15, %v863_v10  ;;  %v764_v20 = vadd.f32 %v763_v16, %v762_v8  ;;  %v868_v31 = vsel %vm737_vm3, %v823_v13, 0.0  ;;  %v767_v32 = vsel %vm737_vm3, %v1192_v1, 0.0  ;;  %730 = vst.msk [vmem:[%s1378_s28 + $0x64] sm:$0xf] %vm704_vm2, %v1145_v37 }
 0x104   : > { %718 = vst.msk [vmem:[%s1378_s28 + $0x34] sm:$0xf] %vm704_vm2, %v1133_v11  ;;  %v866_v25 = vsel %vm737_vm3, %v822_v17, 0.0  ;;  %v870_v40 = vsel %vm737_vm3, %v824_v24, 0.0  ;;  %v1150_v49 = vpack.c.bf16 %v1489_v12, %v1489_v12  ;;  %v827_v50 = vmul.f32 %v1386_v33, %v1386_v33 }
 0x105   : > { %v766_v28 = vadd.f32 %v765_v23, %v764_v20  ;;  %v867_v29 = vadd.f32 %v866_v25, %v865_v19  ;;  %v771_v51 = vsel %vm737_vm3, %v1407_v46, 0.0  ;;  %v1148_v53 = vpack.c.bf16 %v1495_v18, %v1495_v18 }
 0x106   : > { %v773_v54 = vsel %vm737_vm3, %v1386_v33, 0.0  ;;  %735 = vst.msk [vmem:[%s1378_s28 + $0x78] sm:$0xf] %vm704_vm2, %v1150_v49  ;;  %v828_v57 = vmul.f32 %v1401_v42, %v1401_v42  ;;  %v874_v58 = vsel %vm737_vm3, %v826_v44, 0.0  ;;  %v829_v46 = vmul.f32 %v1431_v7, %v1431_v7 }
 0x107   : > { %v869_v38 = vadd.f32 %v868_v31, %v867_v29  ;;  %v768_v39 = vadd.f32 %v767_v32, %v766_v28  ;;  %733 = vst.msk [vmem:[%s1378_s28 + $0x70] sm:$0xf] %vm704_vm2, %v1148_v53  ;;  %v1151_v59 = vpack.c.bf16 %v1501_v22, %v1501_v22  ;;  %v1149_v61 = vpack.c.bf16 %v1507_v27, %v1507_v27 }
 0x108   : > { %v876_v62 = vsel %vm737_vm3, %v827_v50, 0.0  ;;  %v775_v63 = vsel %vm737_vm3, %v1401_v42, 0.0  ;;  %v777_v0 = vsel %vm737_vm3, %v1431_v7, 0.0  ;;  %v878_v4 = vsel %vm737_vm3, %v828_v57, 0.0 }
 0x109   : > { %v770_v45 = vadd.f32 %v769_v34, %v768_v39  ;;  %v871_v48 = vadd.f32 %v870_v40, %v869_v38  ;;  %736 = vst.msk [vmem:[%s1378_s28 + $0x7c] sm:$0xf] %vm704_vm2, %v1151_v59  ;;  %734 = vst.msk [vmem:[%s1378_s28 + $0x74] sm:$0xf] %vm704_vm2, %v1149_v61  ;;  %v880_v5 = vsel %vm737_vm3, %v829_v46, 0.0  ;;  %v830_v6 = vmul.f32 %v1441_v14, %v1441_v14 }
 0x10a   : > { %v831_v42 = vmul.f32 %v1426_v2, %v1426_v2  ;;  %v779_v7 = vsel %vm737_vm3, %v1441_v14, 0.0  ;;  %v781_v15 = vsel %vm737_vm3, %v1426_v2, 0.0  ;;  %v832_v16 = vmul.f32 %v1435_v9, %v1435_v9 }
 0x10b   : > { %v873_v55 = vadd.f32 %v872_v41, %v871_v48  ;;  %v772_v56 = vadd.f32 %v771_v51, %v770_v45  ;;  %v882_v17 = vsel %vm737_vm3, %v830_v6, 0.0  ;;  %v833_v19 = vmul.f32 %v1463_v43, %v1463_v43 }
 0x10c   : > { %v884_v23 = vsel %vm737_vm3, %v831_v42, 0.0  ;;  %v783_v14 = vsel %vm737_vm3, %v1435_v9, 0.0  ;;  %v785_v24 = vsel %vm737_vm3, %v1463_v43, 0.0  ;;  %v886_v26 = vsel %vm737_vm3, %v832_v16, 0.0 }
 0x10d   : > { %v774_v60 = vadd.f32 %v773_v54, %v772_v56  ;;  %v875_v33 = vadd.f32 %v874_v58, %v873_v55  ;;  %v888_v28 = vsel %vm737_vm3, %v833_v19, 0.0  ;;  %v834_v29 = vmul.f32 %v1473_v52, %v1473_v52 }
 0x10e   : > { %v835_v32 = vmul.f32 %v1457_v36, %v1457_v36  ;;  %v787_v9 = vsel %vm737_vm3, %v1473_v52, 0.0  ;;  %v789_v43 = vsel %vm737_vm3, %v1457_v36, 0.0  ;;  %v836_v38 = vmul.f32 %v1467_v47, %v1467_v47 }
 0x10f   : > { %v877_v1 = vadd.f32 %v876_v62, %v875_v33  ;;  %v776_v3 = vadd.f32 %v775_v63, %v774_v60  ;;  %v890_v39 = vsel %vm737_vm3, %v834_v29, 0.0  ;;  %v837_v40 = vmul.f32 %v1495_v18, %v1495_v18 }
 0x110   : > { %v892_v37 = vsel %vm737_vm3, %v835_v32, 0.0  ;;  %v791_v52 = vsel %vm737_vm3, %v1467_v47, 0.0  ;;  %v793_v45 = vsel %vm737_vm3, %v1495_v18, 0.0  ;;  %v894_v49 = vsel %vm737_vm3, %v836_v38, 0.0 }
 0x111   : > { %v778_v8 = vadd.f32 %v777_v0, %v776_v3  ;;  %v879_v10 = vadd.f32 %v878_v4, %v877_v1  ;;  %v896_v50 = vsel %vm737_vm3, %v837_v40, 0.0  ;;  %v838_v51 = vmul.f32 %v1507_v27, %v1507_v27 }
 0x112   : > { %v839_v55 = vmul.f32 %v1489_v12, %v1489_v12  ;;  %v795_v47 = vsel %vm737_vm3, %v1507_v27, 0.0  ;;  %v797_v18 = vsel %vm737_vm3, %v1489_v12, 0.0  ;;  %v840_v58 = vmul.f32 %v1501_v22, %v1501_v22 }
 0x113   : > { %v881_v11 = vadd.f32 %v880_v5, %v879_v10  ;;  %v780_v13 = vadd.f32 %v779_v7, %v778_v8  ;;  %v898_v46 = vsel %vm737_vm3, %v838_v51, 0.0  ;;  %v799_v61 = vsel %vm737_vm3, %v1501_v22, 0.0 }
 0x114   : > { %v900_v33 = vsel %vm737_vm3, %v839_v55, 0.0  ;;  %v902_v63 = vsel %vm737_vm3, %v840_v58, 0.0 }
 0x115   : > { %v782_v20 = vadd.f32 %v781_v15, %v780_v13  ;;  %v883_v21 = vadd.f32 %v882_v17, %v881_v11 }
 0x117   : > { %v885_v25 = vadd.f32 %v884_v23, %v883_v21  ;;  %v784_v2 = vadd.f32 %v783_v14, %v782_v20 }
 0x119   : > { %v786_v30 = vadd.f32 %v785_v24, %v784_v2  ;;  %v887_v31 = vadd.f32 %v886_v26, %v885_v25 }
 0x11b   : > { %v889_v34 = vadd.f32 %v888_v28, %v887_v31  ;;  %v788_v35 = vadd.f32 %v787_v9, %v786_v30 }
 0x11d   : > { %v790_v41 = vadd.f32 %v789_v43, %v788_v35  ;;  %v891_v44 = vadd.f32 %v890_v39, %v889_v34 }
 0x11f   : > { %v893_v48 = vadd.f32 %v892_v37, %v891_v44  ;;  %v792_v36 = vadd.f32 %v791_v52, %v790_v41 }
 0x121   : > { %v794_v53 = vadd.f32 %v793_v45, %v792_v36  ;;  %v895_v54 = vadd.f32 %v894_v49, %v893_v48 }
 0x123   : > { %v897_v56 = vadd.f32 %v896_v50, %v895_v54  ;;  %v796_v57 = vadd.f32 %v795_v47, %v794_v53 }
 0x125   : > { %v798_v59 = vadd.f32 %v797_v18, %v796_v57  ;;  %v899_v60 = vadd.f32 %v898_v46, %v897_v56 }
 0x127   : > { %v800_v62 = vadd.f32 %v799_v61, %v798_v59  ;;  %v901_v27 = vadd.f32 %v900_v33, %v899_v60 }
 0x129   : > { %v801_v0 = vrot.slane %v800_v62, 4  ;;  %v903_v1 = vadd.f32 %v902_v63, %v901_v27 }
 0x12b   : > { %v802_v12 = vadd.f32 %v801_v0, %v800_v62  ;;  %v904_v3 = vrot.slane %v903_v1, 4 }
 0x12d   : > { %v803_v4 = vrot.slane %v802_v12, 2  ;;  %v905_v5 = vadd.f32 %v904_v3, %v903_v1 }
 0x12f   : > { %v804_v6 = vadd.f32 %v803_v4, %v802_v12  ;;  %v906_v8 = vrot.slane %v905_v5, 2 }
 0x131   : > { %v805_v10 = vrot.slane %v804_v6, 1  ;;  %v907_v42 = vadd.f32 %v906_v8, %v905_v5 }
 0x133   : > { %v806_v22 = vadd.f32 %v805_v10, %v804_v6  ;;  %v908_v7 = vrot.slane %v907_v42, 1 }
 0x135   : > { %808 = vst.msk [vmem:[%s228_s5] sm:$0x1] %vm807_vm4, %v806_v22  ;;  %v909_v11 = vadd.f32 %v908_v7, %v907_v42 }
 0x137   : > { %910 = vst.msk [vmem:[%s228_s5 + $0x1] sm:$0x1] %vm807_vm4, %v909_v11 }
 0x138 PF: > { %s14_s14 = sadd.s32 1, %s1282_s14   ;;  %s1637_s12 = smov %s1278_s13 }
 0x139   : > { %p11_p5 = scmp.ge.s32.totalorder %s14_s14, 4   ;;  %s1638_s13 = smov %s1640_s15 }
 0x13b   :  { %13 = sbr.rel (!%p11_p5) target bundleno = 2 (0x2), region = 70 }

</bundles_post_ra>
